<compile_context>
chip_gen: v7x
topology: tpu7x:2x2x1
jax: 0.10.0
libtpu: 0.0.40
codegen_flags: <defaults>
</compile_context>

<pallas_src>
import jax
import jax.numpy as jnp
import numpy as np
from jax.experimental import pallas as pl
from jax.experimental.pallas import tpu as pltpu


def influence_kernel(tableT_ref, x_ref, l_ref, y_ref, out_ref):
    tableT = tableT_ref[...]                  # (D, NDOC) f32, docs on lanes
    x = x_ref[...]                            # (B, 1)  i32
    l = l_ref[...]                            # (B, K)  i32
    y = y_ref[...]                            # (B, 1)  i32

    D, NDOC = tableT.shape
    B, K = l.shape
    f32 = jnp.float32

    # --- in-kernel gather of embx via one-hot over documents (docs on lanes) ---
    doc_iota = jax.lax.broadcasted_iota(jnp.int32, (B, NDOC), 1)        # (B, NDOC)
    onehot_x = (doc_iota == x).astype(f32)                              # (B, NDOC)

    # all_scores[b, j] = sum_d table[x[b], d] * table[j, d]
    # Unrolled D=5 multiply-adds on the VPU; docs (32) stay on the lane axis.
    all_scores = jnp.zeros((B, NDOC), f32)
    for d in range(D):
        row_d = tableT[d:d + 1, :]                                      # (1, NDOC)
        embx_d = jnp.sum(onehot_x * row_d, axis=-1, keepdims=True)      # (B, 1) == table[x[b], d]
        all_scores = all_scores + embx_d * row_d                        # (B, NDOC)

    # --- scores[b, k] = all_scores[b, l[b, k]]  via one-hot over documents ---
    doc_iota3 = jax.lax.broadcasted_iota(jnp.int32, (B, K, NDOC), 2)    # (B, K, NDOC)
    onehot_l = (doc_iota3 == l[:, :, None]).astype(f32)                 # (B, K, NDOC)
    scores = jnp.sum(onehot_l * all_scores[:, None, :], axis=-1)        # (B, K)

    # --- masked softmax pieces (mask built in-kernel from l) ---
    mask = (l > 0).astype(f32)                                          # (B, K)
    masked = jnp.exp(scores) * mask                                     # (B, K)
    denom = jnp.sum(masked, axis=-1, keepdims=True)                     # (B, 1)

    # --- gather the y-th numerator BEFORE normalizing: single (B,1) divide ---
    k_iota = jax.lax.broadcasted_iota(jnp.int32, (B, K), 1)             # (B, K)
    onehot_y = (k_iota == y).astype(f32)                                # (B, K)
    numer = jnp.sum(masked * onehot_y, axis=-1, keepdims=True)          # (B, 1)

    out_ref[...] = numer / denom                                        # (B, 1)


def influence_forward(emb_table, x, y, l):
    """emb_table: (num_documents, 5) f32; x: (B,1) or (B,) int; y: (B,) int; l: (B,K) int."""
    tableT = jnp.asarray(emb_table, jnp.float32).T        # (D, NDOC): docs on the lane axis
    x2 = x.astype(jnp.int32).reshape(-1, 1)               # (B, 1)
    y2 = y.astype(jnp.int32).reshape(-1, 1)               # (B, 1)
    l2 = l.astype(jnp.int32)                              # (B, K)

    B, K = l2.shape
    out = pl.pallas_call(
        influence_kernel,
        out_shape=jax.ShapeDtypeStruct((B, 1), jnp.float32),
        in_specs=[
            pl.BlockSpec(memory_space=pltpu.MemorySpace.VMEM),  # tableT (5, NDOC)
            pl.BlockSpec(memory_space=pltpu.MemorySpace.VMEM),  # x (B, 1)
            pl.BlockSpec(memory_space=pltpu.MemorySpace.VMEM),  # l (B, K)
            pl.BlockSpec(memory_space=pltpu.MemorySpace.VMEM),  # y (B, 1)
        ],
        out_specs=pl.BlockSpec(memory_space=pltpu.MemorySpace.VMEM),
        # TODO(synk): if B scales up, add a B-tiled grid with
        # dimension_semantics=("parallel",) and a lane-dense (tile, 128k) output.
    )(tableT, x2, l2, y2)
    return out[:, 0]                                       # (B,)


def influence_reference(emb_table, x, y, l):
    """Pure-JAX reference mirroring the PyTorch forward."""
    embx = emb_table[x.reshape(-1)]
    emby = emb_table[l]
    mask = (l > 0).astype(jnp.float32)
    scores = jnp.einsum('ij,ikj->ik', embx, emby)
    masked = jnp.exp(scores) * mask
    probs = masked / jnp.sum(masked, axis=-1, keepdims=True)
    return probs[jnp.arange(y.shape[0]), y]


if __name__ == "__main__":
    num_documents = 32
    B, K, D = 8, 16, 5

    key = jax.random.PRNGKey(0)
    k_emb, k_x, k_y, k_l = jax.random.split(key, 4)

    # Deterministic "nn.Embedding(num_documents, 5)" weights.
    emb_table = jax.random.normal(k_emb, (num_documents, D), dtype=jnp.float32)

    x = jax.random.randint(k_x, (B, 1), 0, num_documents, dtype=jnp.int32)
    y = jax.random.randint(k_y, (B,), 0, K, dtype=jnp.int32)
    l = jax.random.randint(k_l, (B, K), 0, num_documents, dtype=jnp.int32)

    res = influence_forward(emb_table, x, y, l)
    res = jax.block_until_ready(res)

    ref = influence_reference(emb_table, x, y, l)
    np.testing.assert_allclose(np.asarray(res), np.asarray(ref), rtol=1e-5, atol=1e-6)

    print("KERNEL_OK")
</pallas_src>

<mosaic_0001>
module attributes {stable_mosaic.version = 11 : i64} {
  func.func @influence_kernel(%arg0: memref<5x32xf32, #tpu.memory_space<vmem>>, %arg1: memref<8x1xi32, #tpu.memory_space<vmem>>, %arg2: memref<8x16xi32, #tpu.memory_space<vmem>>, %arg3: memref<8x1xi32, #tpu.memory_space<vmem>>, %arg4: memref<8x1xf32, #tpu.memory_space<vmem>>) attributes {dimension_semantics = [], scalar_prefetch = 0 : i64, scratch_operands = 0 : i64, tpu.core_type = #tpu.core_type<tc>} {
    %c0 = arith.constant 0 : index
    %c0_0 = arith.constant 0 : index
    %0 = vector.load %arg0[%c0, %c0_0] : memref<5x32xf32, #tpu.memory_space<vmem>>, vector<5x32xf32>
    %c0_1 = arith.constant 0 : index
    %c0_2 = arith.constant 0 : index
    %1 = vector.load %arg1[%c0_1, %c0_2] : memref<8x1xi32, #tpu.memory_space<vmem>>, vector<8x1xi32>
    %c0_3 = arith.constant 0 : index
    %c0_4 = arith.constant 0 : index
    %2 = vector.load %arg2[%c0_3, %c0_4] : memref<8x16xi32, #tpu.memory_space<vmem>>, vector<8x16xi32>
    %c0_5 = arith.constant 0 : index
    %c0_6 = arith.constant 0 : index
    %3 = vector.load %arg3[%c0_5, %c0_6] : memref<8x1xi32, #tpu.memory_space<vmem>>, vector<8x1xi32>
    %4 = tpu.iota {dimensions = array<i32: 1>} : vector<8x32xi32>
    %5 = vector.broadcast %1 : vector<8x1xi32> to vector<8x32xi32>
    %6 = arith.cmpi eq, %4, %5 : vector<8x32xi32>
    %7 = arith.extui %6 : vector<8x32xi1> to vector<8x32xi32>
    %8 = arith.sitofp %7 : vector<8x32xi32> to vector<8x32xf32>
    %cst = arith.constant 0.000000e+00 : f32
    %9 = vector.broadcast %cst : f32 to vector<8x32xf32>
    %10 = vector.extract_strided_slice %0 {offsets = [0, 0], sizes = [1, 32], strides = [1, 1]} : vector<5x32xf32> to vector<1x32xf32>
    %11 = vector.broadcast %10 : vector<1x32xf32> to vector<8x32xf32>
    %12 = arith.mulf %8, %11 : vector<8x32xf32>
    %cst_7 = arith.constant dense<0.000000e+00> : vector<8xf32>
    %13 = vector.multi_reduction <add>, %12, %cst_7 [1] : vector<8x32xf32> to vector<8xf32>
    %14 = vector.shape_cast %13 : vector<8xf32> to vector<8x1xf32>
    %15 = vector.broadcast %14 : vector<8x1xf32> to vector<8x32xf32>
    %16 = vector.broadcast %10 : vector<1x32xf32> to vector<8x32xf32>
    %17 = arith.mulf %15, %16 : vector<8x32xf32>
    %18 = arith.addf %9, %17 : vector<8x32xf32>
    %19 = vector.extract_strided_slice %0 {offsets = [1, 0], sizes = [1, 32], strides = [1, 1]} : vector<5x32xf32> to vector<1x32xf32>
    %20 = vector.broadcast %19 : vector<1x32xf32> to vector<8x32xf32>
    %21 = arith.mulf %8, %20 : vector<8x32xf32>
    %cst_8 = arith.constant dense<0.000000e+00> : vector<8xf32>
    %22 = vector.multi_reduction <add>, %21, %cst_8 [1] : vector<8x32xf32> to vector<8xf32>
    %23 = vector.shape_cast %22 : vector<8xf32> to vector<8x1xf32>
    %24 = vector.broadcast %23 : vector<8x1xf32> to vector<8x32xf32>
    %25 = vector.broadcast %19 : vector<1x32xf32> to vector<8x32xf32>
    %26 = arith.mulf %24, %25 : vector<8x32xf32>
    %27 = arith.addf %18, %26 : vector<8x32xf32>
    %28 = vector.extract_strided_slice %0 {offsets = [2, 0], sizes = [1, 32], strides = [1, 1]} : vector<5x32xf32> to vector<1x32xf32>
    %29 = vector.broadcast %28 : vector<1x32xf32> to vector<8x32xf32>
    %30 = arith.mulf %8, %29 : vector<8x32xf32>
    %cst_9 = arith.constant dense<0.000000e+00> : vector<8xf32>
    %31 = vector.multi_reduction <add>, %30, %cst_9 [1] : vector<8x32xf32> to vector<8xf32>
    %32 = vector.shape_cast %31 : vector<8xf32> to vector<8x1xf32>
    %33 = vector.broadcast %32 : vector<8x1xf32> to vector<8x32xf32>
    %34 = vector.broadcast %28 : vector<1x32xf32> to vector<8x32xf32>
    %35 = arith.mulf %33, %34 : vector<8x32xf32>
    %36 = arith.addf %27, %35 : vector<8x32xf32>
    %37 = vector.extract_strided_slice %0 {offsets = [3, 0], sizes = [1, 32], strides = [1, 1]} : vector<5x32xf32> to vector<1x32xf32>
    %38 = vector.broadcast %37 : vector<1x32xf32> to vector<8x32xf32>
    %39 = arith.mulf %8, %38 : vector<8x32xf32>
    %cst_10 = arith.constant dense<0.000000e+00> : vector<8xf32>
    %40 = vector.multi_reduction <add>, %39, %cst_10 [1] : vector<8x32xf32> to vector<8xf32>
    %41 = vector.shape_cast %40 : vector<8xf32> to vector<8x1xf32>
    %42 = vector.broadcast %41 : vector<8x1xf32> to vector<8x32xf32>
    %43 = vector.broadcast %37 : vector<1x32xf32> to vector<8x32xf32>
    %44 = arith.mulf %42, %43 : vector<8x32xf32>
    %45 = arith.addf %36, %44 : vector<8x32xf32>
    %46 = vector.extract_strided_slice %0 {offsets = [4, 0], sizes = [1, 32], strides = [1, 1]} : vector<5x32xf32> to vector<1x32xf32>
    %47 = vector.broadcast %46 : vector<1x32xf32> to vector<8x32xf32>
    %48 = arith.mulf %8, %47 : vector<8x32xf32>
    %cst_11 = arith.constant dense<0.000000e+00> : vector<8xf32>
    %49 = vector.multi_reduction <add>, %48, %cst_11 [1] : vector<8x32xf32> to vector<8xf32>
    %50 = vector.shape_cast %49 : vector<8xf32> to vector<8x1xf32>
    %51 = vector.broadcast %50 : vector<8x1xf32> to vector<8x32xf32>
    %52 = vector.broadcast %46 : vector<1x32xf32> to vector<8x32xf32>
    %53 = arith.mulf %51, %52 : vector<8x32xf32>
    %54 = arith.addf %45, %53 : vector<8x32xf32>
    %55 = tpu.iota {dimensions = array<i32: 2>} : vector<8x16x32xi32>
    %56 = vector.shape_cast %2 : vector<8x16xi32> to vector<8x16x1xi32>
    %57 = vector.broadcast %56 : vector<8x16x1xi32> to vector<8x16x32xi32>
    %58 = arith.cmpi eq, %55, %57 : vector<8x16x32xi32>
    %59 = arith.extui %58 : vector<8x16x32xi1> to vector<8x16x32xi32>
    %60 = arith.sitofp %59 : vector<8x16x32xi32> to vector<8x16x32xf32>
    %61 = vector.shape_cast %54 : vector<8x32xf32> to vector<8x1x32xf32>
    %62 = vector.broadcast %61 : vector<8x1x32xf32> to vector<8x16x32xf32>
    %63 = arith.mulf %60, %62 : vector<8x16x32xf32>
    %cst_12 = arith.constant dense<0.000000e+00> : vector<8x16xf32>
    %64 = vector.multi_reduction <add>, %63, %cst_12 [2] : vector<8x16x32xf32> to vector<8x16xf32>
    %c0_i32 = arith.constant 0 : i32
    %65 = vector.broadcast %c0_i32 : i32 to vector<8x16xi32>
    %66 = arith.cmpi sgt, %2, %65 : vector<8x16xi32>
    %67 = arith.extui %66 : vector<8x16xi1> to vector<8x16xi32>
    %68 = arith.sitofp %67 : vector<8x16xi32> to vector<8x16xf32>
    %69 = math.exp %64 : vector<8x16xf32>
    %70 = arith.mulf %69, %68 : vector<8x16xf32>
    %cst_13 = arith.constant dense<0.000000e+00> : vector<8xf32>
    %71 = vector.multi_reduction <add>, %70, %cst_13 [1] : vector<8x16xf32> to vector<8xf32>
    %72 = vector.shape_cast %71 : vector<8xf32> to vector<8x1xf32>
    %73 = tpu.iota {dimensions = array<i32: 1>} : vector<8x16xi32>
    %74 = vector.broadcast %3 : vector<8x1xi32> to vector<8x16xi32>
    %75 = arith.cmpi eq, %73, %74 : vector<8x16xi32>
    %76 = arith.extui %75 : vector<8x16xi1> to vector<8x16xi32>
    %77 = arith.sitofp %76 : vector<8x16xi32> to vector<8x16xf32>
    %78 = arith.mulf %70, %77 : vector<8x16xf32>
    %cst_14 = arith.constant dense<0.000000e+00> : vector<8xf32>
    %79 = vector.multi_reduction <add>, %78, %cst_14 [1] : vector<8x16xf32> to vector<8xf32>
    %80 = vector.shape_cast %79 : vector<8xf32> to vector<8x1xf32>
    %81 = arith.divf %80, %72 : vector<8x1xf32>
    %c0_15 = arith.constant 0 : index
    %c0_16 = arith.constant 0 : index
    %82 = vector.load %arg4[%c0_15, %c0_16] : memref<8x1xf32, #tpu.memory_space<vmem>>, vector<8x1xf32>
    tpu.vector_store %arg4[%c0_15, %c0_16], %81 {strides = array<i32>} : memref<8x1xf32, #tpu.memory_space<vmem>>, vector<8x1xf32>,
    return
  }
}

</mosaic_0001>

<bundles_post_ra>
// kernel: tpu_custom_call.1
= control target key start
LH: loop header
LB: loop body
LE: loop exit
PB: predicated region body
PF: predicated region fallthrough
CT: control target
= control target key end

     0   :  { %v21_v0 = vlaneseq  ;;  %v1023_v1 = vmov 0   ;;  %v1024_v19 = vmov 0.0   ;;  %vm34_vm2 = vcmask 261120   ;;  %s1461_s1 = inlined_call_operand.vmem [shape: s32[8,1], index: 1, kind: input, shape index: {}]   ;;  %s1462_s2 = inlined_call_operand.vmem [shape: s32[8,16], index: 2, kind: input, shape index: {}]   ;;  %s1463_s3 = inlined_call_operand.vmem [shape: s32[8,1], index: 3, kind: input, shape index: {}]   ;;  %s1464_s0 = inlined_call_operand.vmem [shape: f32[5,32], index: 0, kind: input, shape index: {}]   ;;  %s1465_s4 = inlined_call_operand.vmem [shape: f32[8,1], index: 4, kind: output, shape index: {}]  }
   0x1   :  { %987 = vset.pattern.permute.xlu0 %v1023_v1  ;;  %v18_v2 = vld [vmem:[%s1461_s1] sm:$0xff]  ;;  %988 = vset.pattern.permute.xlu1 %v1023_v1 }
   0x2   :  { %24 = vperm.xlu0 %987, %v18_v2   ;;  %v1055_v3 = vshrl.u32 %v21_v0, 7  ;;  %v19_v4 = vld [vmem:[%s1462_s2] sm:$0xff]  ;;  %v1116_v32 = vand.u32 127, %v21_v0 }
   0x3   :  { %vm370_vm0 = vcmp.gt.s32.totalorder %v19_v4, 0  ;;  %v20_v29 = vld [vmem:[%s1463_s3] sm:$0xff] }
   0x4   :  { %v1061_v5 = vsub.s32 0, %v1055_v3  ;;  %v1064_v6 = vsub.s32 1, %v1055_v3  ;;  %v1069_v9 = vsub.s32 4, %v1055_v3  ;;  %v1073_v11 = vsub.s32 5, %v1055_v3  ;;  %v17_v31 = vld [vmem:[%s1464_s0] sm:$0x1f] }
   0x5   :  { %v1076_v12 = vsub.s32 2, %v1055_v3  ;;  %v1080_v14 = vsub.s32 6, %v1055_v3  ;;  %v1085_v17 = vsub.s32 7, %v1055_v3  ;;  %v1088_v18 = vsub.s32 3, %v1055_v3 }
   0x6   :  { %v83_v7 = vrot.slane %v19_v4, %v1061_v5  ;;  %v94_v8 = vrot.slane %v19_v4, %v1064_v6  ;;  %v127_v10 = vrot.slane %v19_v4, %v1069_v9  ;;  %v138_v13 = vrot.slane %v19_v4, %v1073_v11 }
   0x7   :  { %v105_v15 = vrot.slane %v19_v4, %v1076_v12  ;;  %v149_v16 = vrot.slane %v19_v4, %v1080_v14  ;;  %v1091_v20 = vsel %vm370_vm0, 1.0, %v1024_v19  ;;  %v160_v21 = vrot.slane %v19_v4, %v1085_v17 }
   0x8   :  { %85 = vbcast.lane.b32.xlu1 %v83_v7, 256  ;;  %96 = vbcast.lane.b32.xlu0 %v94_v8, 256  ;;  %v116_v22 = vrot.slane %v19_v4, %v1088_v18  ;;  %v409_v23 = vrot.slane %v1091_v20, %v1061_v5  ;;  %v420_v24 = vrot.slane %v1091_v20, %v1064_v6 }
   0x9   :  { %v431_v25 = vrot.slane %v1091_v20, %v1076_v12  ;;  %v442_v26 = vrot.slane %v1091_v20, %v1088_v18  ;;  %v453_v27 = vrot.slane %v1091_v20, %v1069_v9  ;;  %v464_v28 = vrot.slane %v1091_v20, %v1073_v11 }
   0xa   :  { %v1121_v34 = vrot.slane %v17_v31, %v1064_v6  ;;  %v1124_v35 = vrot.slane %v17_v31, %v1061_v5  ;;  %v1128_v37 = vrot.slane %v17_v31, %v1076_v12  ;;  %v1139_v45 = vrot.slane %v17_v31, %v1088_v18 }
   0xb   :  { %v1146_v49 = vrot.slane %v17_v31, %v1069_v9  ;;  %v475_v56 = vrot.slane %v1091_v20, %v1080_v14  ;;  %v486_v58 = vrot.slane %v1091_v20, %v1085_v17 }
   0xc   :  { %89 = vbcast.lane.b32.xlu1 %v83_v7, 264  ;;  %129 = vbcast.lane.b32.xlu0 %v127_v10, 256 }
  0x10   :  { %100 = vbcast.lane.b32.xlu1 %v94_v8, 264  ;;  %140 = vbcast.lane.b32.xlu0 %v138_v13, 256 }
  0x14   :  { %107 = vbcast.lane.b32.xlu1 %v105_v15, 256  ;;  %151 = vbcast.lane.b32.xlu0 %v149_v16, 256 }
  0x18   :  { %111 = vbcast.lane.b32.xlu1 %v105_v15, 264  ;;  %162 = vbcast.lane.b32.xlu0 %v160_v21, 256 }
  0x1c   :  { %118 = vbcast.lane.b32.xlu1 %v116_v22, 256  ;;  %411 = vbcast.lane.b32.xlu0 %v409_v23, 256 }
  0x20   :  { %122 = vbcast.lane.b32.xlu1 %v116_v22, 264  ;;  %422 = vbcast.lane.b32.xlu0 %v420_v24, 256 }
  0x24   :  { %133 = vbcast.lane.b32.xlu1 %v127_v10, 264  ;;  %433 = vbcast.lane.b32.xlu0 %v431_v25, 256 }
  0x28   :  { %144 = vbcast.lane.b32.xlu1 %v138_v13, 264  ;;  %444 = vbcast.lane.b32.xlu0 %v442_v26, 256 }
  0x2c   :  { %155 = vbcast.lane.b32.xlu1 %v149_v16, 264  ;;  %455 = vbcast.lane.b32.xlu0 %v453_v27, 256 }
  0x30   :  { %166 = vbcast.lane.b32.xlu1 %v160_v21, 264  ;;  %466 = vbcast.lane.b32.xlu0 %v464_v28, 256 }
  0x34   :  { %684 = vperm.xlu1 %988, %v20_v29  }
  0x38   :  { %415 = vbcast.lane.b32.xlu1 %v409_v23, 264 }
  0x3c   :  { %426 = vbcast.lane.b32.xlu1 %v420_v24, 264 }
  0x40   :  { %437 = vbcast.lane.b32.xlu1 %v431_v25, 264 }
  0x44   :  { %448 = vbcast.lane.b32.xlu1 %v442_v26, 264 }
  0x48   :  { %459 = vbcast.lane.b32.xlu1 %v453_v27, 264 }
  0x7a   :  { %v1110_v30 = vpop.permute.xlu1 %85 }
  0x7b   :  { %vm168_vm4 = vcmp.eq.s32.totalorder %v1116_v32, %v1110_v30 }
  0x7e   :  { %v1118_v33 = vpop.permute.xlu1 %89 }
  0x7f   :  { %vm169_vm5 = vcmp.eq.s32.totalorder %v1116_v32, %v1118_v33 }
  0x81   :  { %v25_v36 = vpop.permute.xlu0 %24 }
  0x82   :  { %vm26_vm1 = vcmp.eq.s32.totalorder %v1116_v32, %v25_v36  ;;  %v1130_v38 = vpop.permute.xlu1 %100 }
  0x83   :  { %v965_v39 = vsel %vm26_vm1, 1.0, %v1024_v19  ;;  %vm171_vm8 = vcmp.eq.s32.totalorder %v1116_v32, %v1130_v38 }
  0x84   :  { %v44_v40 = vmul.f32 %v965_v39, %v1121_v34  ;;  %v33_v41 = vmul.f32 %v965_v39, %v1124_v35  ;;  %v54_v44 = vmul.f32 %v965_v39, %v1128_v37  ;;  %v64_v48 = vmul.f32 %v965_v39, %v1139_v45 }
  0x85   :  { %v74_v52 = vmul.f32 %v965_v39, %v1146_v49  ;;  %v97_v8 = vpop.permute.xlu0 %96  ;;  %v1025_v39 = vmov 1966171168  }
  0x86   :  { %v45_v42 = vsel %vm34_vm2, %v44_v40, 0.0  ;;  %v35_v43 = vsel %vm34_vm2, %v33_v41, 0.0  ;;  %v1141_v46 = vpop.permute.xlu1 %107  ;;  %v55_v47 = vsel %vm34_vm2, %v54_v44, 0.0  ;;  %v65_v51 = vsel %vm34_vm2, %v64_v48, 0.0 }
  0x87   :  { %46 = vadd.xlane.f32.xlu1 %v45_v42  ;;  %36 = vadd.xlane.f32.xlu0 %v35_v43  ;;  %v75_v54 = vsel %vm34_vm2, %v74_v52, 0.0  ;;  %v219_v40 = vunpack.c.l.s4 %v1025_v39  ;;  %vm170_vm6 = vcmp.eq.s32.totalorder %v1116_v32, %v97_v8  ;;  %v969_v39 = vsel %vm171_vm8, 1.0, %v1024_v19 }
  0x88   :  { %v968_v8 = vsel %vm170_vm6, 1.0, %v1024_v19  ;;  %vm172_vm9 = vcmp.eq.s32.totalorder %v1116_v32, %v1141_v46  ;;  %vm666_vm6 = vcmask 1042434   ;;  %vm670_vm8 = vcmask 1044484  }
  0x89   :  { %v130_v10 = vpop.permute.xlu0 %129 }
  0x8a   :  { %v1148_v50 = vpop.permute.xlu1 %111  ;;  %vm176_vm7 = vcmp.eq.s32.totalorder %v1116_v32, %v130_v10 }
  0x8b   :  { %56 = vadd.xlane.f32.xlu1 %v55_v47  ;;  %v220_v47 = vunpack.c.0.s8 %v219_v40  ;;  %v974_v10 = vsel %vm176_vm7, 1.0, %v1024_v19  ;;  %vm173_vm10 = vcmp.eq.s32.totalorder %v1116_v32, %v1148_v50  ;;  %vm668_vm7 = vcmask 1043459  }
  0x8c   :  { %v971_v46 = vsel %vm173_vm10, 1.0, %v1024_v19  ;;  %vm674_vm10 = vcmask 1046534  }
  0x8e   :  { %v1152_v53 = vpop.permute.xlu1 %118 }
  0x8f   :  { %66 = vadd.xlane.f32.xlu1 %v65_v51  ;;  %vm174_vm12 = vcmp.eq.s32.totalorder %v1116_v32, %v1152_v53 }
  0x92   :  { %v1155_v55 = vpop.permute.xlu1 %122 }
  0x93   :  { %76 = vadd.xlane.f32.xlu1 %v75_v54  ;;  %v223_v54 = vsub.s32 %v220_v47, %v1055_v3  ;;  %vm175_vm13 = vcmp.eq.s32.totalorder %v1116_v32, %v1155_v55 }
  0x96   :  { %v1159_v57 = vpop.permute.xlu1 %133 }
  0x97   :  { %vm177_vm11 = vcmp.eq.s32.totalorder %v1116_v32, %v1159_v57 }
  0x9a   :  { %v1163_v59 = vpop.permute.xlu1 %144 }
  0x9b   :  { %vm179_vm15 = vcmp.eq.s32.totalorder %v1116_v32, %v1163_v59 }
  0x9d   :  { %477 = vbcast.lane.b32.xlu0 %v475_v56, 256 }
  0x9e   :  { %v1165_v60 = vpop.permute.xlu1 %155 }
  0x9f   :  { %vm181_vm1 = vcmp.eq.s32.totalorder %v1116_v32, %v1165_v60 }
  0xa1   :  { %488 = vbcast.lane.b32.xlu0 %v486_v58, 256 }
  0xa2   :  { %v1167_v61 = vpop.permute.xlu1 %166 }
  0xa4   :  { %470 = vbcast.lane.b32.xlu1 %v464_v28, 264 }
  0xa8   :  { %481 = vbcast.lane.b32.xlu1 %v475_v56, 264 }
  0xac   :  { %492 = vbcast.lane.b32.xlu1 %v486_v58, 264 }
  0xb3   :  { %v685_v62 = vpop.permute.xlu1 %684 }
  0xb4   :  { %vm686_vm3 = vcmp.eq.s32.totalorder %v1116_v32, %v685_v62 }
  0xb5   :  { %v1171_v63 = vsel %vm686_vm3, 1.0, %v1024_v19 }
  0xb6   :  { %v693_v0 = vrot.slane %v1171_v63, %v1061_v5  ;;  %v704_v1 = vrot.slane %v1171_v63, %v1064_v6  ;;  %v715_v2 = vrot.slane %v1171_v63, %v1076_v12  ;;  %v726_v4 = vrot.slane %v1171_v63, %v1088_v18  ;;  %v1185_v12 = vpop.permute.xlu0 %140 }
  0xb7   :  { %v737_v7 = vrot.slane %v1171_v63, %v1069_v9  ;;  %v748_v6 = vrot.slane %v1171_v63, %v1073_v11  ;;  %v1193_v18 = vpop.permute.xlu1 %415  ;;  %vm178_vm14 = vcmp.eq.s32.totalorder %v1116_v32, %v1185_v12 }
  0xb8   :  { %699 = vbcast.lane.b32.xlu1 %v693_v0, 264  ;;  %695 = vbcast.lane.b32.xlu0 %v693_v0, 256 }
  0xba   :  { %v1187_v13 = vpop.permute.xlu0 %151 }
  0xbb   :  { %v1197_v20 = vpop.permute.xlu1 %426  ;;  %vm180_vm0 = vcmp.eq.s32.totalorder %v1116_v32, %v1187_v13 }
  0xbc   :  { %710 = vbcast.lane.b32.xlu1 %v704_v1, 264  ;;  %706 = vbcast.lane.b32.xlu0 %v704_v1, 256  ;;  %v978_v59 = vsel %vm180_vm0, 1.0, %v1024_v19 }
  0xbe   :  { %v1189_v15 = vpop.permute.xlu0 %162 }
  0xbf   :  { %v1201_v11 = vpop.permute.xlu1 %437  ;;  %vm182_vm3 = vcmp.eq.s32.totalorder %v1116_v32, %v1189_v15 }
  0xc0   :  { %721 = vbcast.lane.b32.xlu1 %v715_v2, 264  ;;  %717 = vbcast.lane.b32.xlu0 %v715_v2, 256  ;;  %v966_v2 = vsel %vm168_vm4, 1.0, %v1024_v19  ;;  %vm183_vm4 = vcmp.eq.s32.totalorder %v1116_v32, %v1167_v61 }
  0xc2   :  { %v1191_v16 = vpop.permute.xlu0 %411 }
  0xc3   :  { %v1205_v23 = vpop.permute.xlu1 %448 }
  0xc4   :  { %732 = vbcast.lane.b32.xlu1 %v726_v4, 264  ;;  %728 = vbcast.lane.b32.xlu0 %v726_v4, 256  ;;  %v967_v4 = vsel %vm169_vm5, 1.0, %v1024_v19  ;;  %vm664_vm5 = vcmask 1041409  }
  0xc6   :  { %v1195_v9 = vpop.permute.xlu0 %422 }
  0xc7   :  { %v1209_v25 = vpop.permute.xlu1 %459 }
  0xc8   :  { %743 = vbcast.lane.b32.xlu1 %v737_v7, 264  ;;  %739 = vbcast.lane.b32.xlu0 %v737_v7, 256 }
  0xca   :  { %v1199_v21 = vpop.permute.xlu0 %433 }
  0xcc   :  { %754 = vbcast.lane.b32.xlu1 %v748_v6, 264  ;;  %750 = vbcast.lane.b32.xlu0 %v748_v6, 256 }
  0xce   :  { %v1203_v22 = vpop.permute.xlu0 %444 }
  0xd2   :  { %v1207_v24 = vpop.permute.xlu0 %455 }
  0xd6   :  { %v1211_v26 = vpop.permute.xlu0 %466 }
 0x114   :  { %v47_v27 = vpop.xlane.xlu1 %46  ;;  %v37_v28 = vpop.xlane.xlu0 %36 }
 0x115   :  { %v48_v31 = vmul.f32 %v47_v27, %v1121_v34  ;;  %v38_v36 = vmul.f32 %v37_v28, %v1124_v35 }
 0x117   :  { %v49_v43 = vadd.f32 %v48_v31, %v38_v36 }
 0x118   :  { %v57_v29 = vpop.xlane.xlu1 %56  ;;  %v1302_v61 = vpop.permute.xlu0 %477 }
 0x119   :  { %v58_v41 = vmul.f32 %v57_v29, %v1128_v37 }
 0x11b   :  { %v59_v48 = vadd.f32 %v58_v41, %v49_v43  ;;  %v970_v43 = vsel %vm172_vm9, 1.0, %v1024_v19  ;;  %vm672_vm9 = vcmask 1045509  }
 0x11c   :  { %v67_v42 = vpop.xlane.xlu1 %66 }
 0x11d   :  { %v68_v44 = vmul.f32 %v67_v42, %v1139_v45 }
 0x11f   :  { %v69_v52 = vadd.f32 %v68_v44, %v59_v48 }
 0x120   :  { %v77_v51 = vpop.xlane.xlu1 %76 }
 0x121   :  { %v78_v56 = vmul.f32 %v77_v51, %v1146_v49 }
 0x123   :  { %v79_v58 = vadd.f32 %v78_v56, %v69_v52  ;;  %v975_v56 = vsel %vm177_vm11, 1.0, %v1024_v19  ;;  %vm676_vm11 = vcmask 1047559  }
 0x125   :  { %v217_v34 = vcombine.high %v79_v58, %v79_v58  ;;  %v224_v62 = vrot.slane %v79_v58, %v223_v54 }
 0x127   :  { %v231_v35 = vrot.slane %v217_v34, %v223_v54  ;;  %v232_v37 = vcombine.high %v224_v62, %v224_v62  ;;  %v240_v45 = vrot.slane %v224_v62, %v223_v54 }
 0x129   :  { %v269_v0 = vrot.slane %v240_v45, %v1061_v5  ;;  %v254_v1 = vrot.slane %v232_v37, %v223_v54  ;;  %v1226_v49 = vrot.slane %v231_v35, %v223_v54  ;;  %v262_v27 = vcombine.high %v240_v45, %v240_v45 }
 0x12a   :  { %v233_v62 = vcombine.high %v231_v35, %v231_v35  ;;  %v972_v37 = vsel %vm174_vm12, 1.0, %v1024_v19  ;;  %v759_v45 = vrot.slane %v1171_v63, %v1080_v14  ;;  %v976_v14 = vsel %vm178_vm14, 1.0, %v1024_v19 }
 0x12b   :  { %v307_v30 = vmul.f32 %v967_v4, %v269_v0  ;;  %v306_v7 = vmul.f32 %v966_v2, %v269_v0  ;;  %v273_v33 = vrot.slane %v254_v1, %v1061_v5  ;;  %v285_v6 = vrot.slane %v1226_v49, %v1061_v5 }
 0x12c   :  { %v277_v42 = vrot.slane %v262_v27, %v1061_v5  ;;  %v264_v52 = vcombine.high %v254_v1, %v254_v1  ;;  %v261_v0 = vrot.slane %v233_v62, %v223_v54  ;;  %v973_v1 = vsel %vm175_vm13, 1.0, %v1024_v19 }
 0x12d   :  { %v325_v28 = vsel %vm34_vm2, %v307_v30, 0.0  ;;  %v322_v29 = vsel %vm34_vm2, %v306_v7, 0.0  ;;  %v308_v31 = vmul.f32 %v968_v8, %v273_v33  ;;  %v314_v36 = vmul.f32 %v974_v10, %v285_v6 }
 0x12e   :  { %326 = vadd.xlane.f32.xlu1 %v325_v28  ;;  %323 = vadd.xlane.f32.xlu0 %v322_v29  ;;  %v309_v41 = vmul.f32 %v969_v39, %v273_v33  ;;  %v310_v47 = vmul.f32 %v970_v43, %v277_v42  ;;  %v311_v51 = vmul.f32 %v971_v46, %v277_v42  ;;  %v977_v7 = vsel %vm179_vm15, 1.0, %v1024_v19  ;;  %v1306_v42 = vpop.permute.xlu0 %488 }
 0x12f   :  { %v328_v38 = vsel %vm34_vm2, %v308_v31, 0.0  ;;  %v346_v40 = vsel %vm34_vm2, %v314_v36, 0.0  ;;  %v315_v58 = vmul.f32 %v975_v56, %v285_v6  ;;  %v281_v34 = vrot.slane %v264_v52, %v1061_v5 }
 0x130   :  { %v331_v44 = vsel %vm34_vm2, %v309_v41, 0.0  ;;  %v334_v48 = vsel %vm34_vm2, %v310_v47, 0.0  ;;  %v337_v50 = vsel %vm34_vm2, %v311_v51, 0.0  ;;  %v770_v2 = vrot.slane %v1171_v63, %v1085_v17 }
 0x131   :  { %v349_v57 = vsel %vm34_vm2, %v315_v58, 0.0  ;;  %v312_v53 = vmul.f32 %v972_v37, %v281_v34  ;;  %v313_v55 = vmul.f32 %v973_v1, %v281_v34  ;;  %v289_v4 = vrot.slane %v261_v0, %v1061_v5 }
 0x132   :  { %329 = vadd.xlane.f32.xlu0 %v328_v38  ;;  %347 = vadd.xlane.f32.xlu1 %v346_v40  ;;  %v263_v12 = vcombine.high %v1226_v49, %v1226_v49  ;;  %v265_v8 = vcombine.high %v261_v0, %v261_v0  ;;  %v979_v10 = vsel %vm181_vm1, 1.0, %v1024_v19  ;;  %v980_v29 = vsel %vm182_vm3, 1.0, %v1024_v19  ;;  %v1310_v43 = vpop.permute.xlu0 %695 }
 0x133   :  { %v340_v35 = vsel %vm34_vm2, %v312_v53, 0.0  ;;  %v343_v54 = vsel %vm34_vm2, %v313_v55, 0.0  ;;  %v316_v30 = vmul.f32 %v976_v14, %v289_v4  ;;  %v317_v63 = vmul.f32 %v977_v7, %v289_v4 }
 0x134   :  { %v293_v33 = vrot.slane %v263_v12, %v1061_v5  ;;  %v297_v28 = vrot.slane %v265_v8, %v1061_v5  ;;  %v981_v36 = vsel %vm183_vm4, 1.0, %v1024_v19  ;;  %v1298_v5 = vpop.permute.xlu1 %470  ;;  %vm679_vm12 = vcmask 130048  }
 0x135   :  { %v352_v17 = vsel %vm34_vm2, %v316_v30, 0.0  ;;  %v355_v6 = vsel %vm34_vm2, %v317_v63, 0.0  ;;  %vm959_vm13 = vcmask 7168  }
 0x136   :  { %332 = vadd.xlane.f32.xlu0 %v331_v44  ;;  %v318_v49 = vmul.f32 %v978_v59, %v293_v33  ;;  %v319_v27 = vmul.f32 %v979_v10, %v293_v33  ;;  %v320_v31 = vmul.f32 %v980_v29, %v297_v28  ;;  %v321_v15 = vmul.f32 %v981_v36, %v297_v28  ;;  %v1314_v47 = vpop.permute.xlu0 %706 }
 0x138   :  { %v358_v13 = vsel %vm34_vm2, %v318_v49, 0.0  ;;  %v361_v60 = vsel %vm34_vm2, %v319_v27, 0.0  ;;  %v364_v39 = vsel %vm34_vm2, %v320_v31, 0.0  ;;  %v367_v38 = vsel %vm34_vm2, %v321_v15, 0.0  ;;  %v1300_v40 = vpop.permute.xlu1 %481 }
 0x139   :  { %vm599_vm2 = vcmask 130112  }
 0x13a   :  { %335 = vadd.xlane.f32.xlu0 %v334_v48  ;;  %v1318_v48 = vpop.permute.xlu0 %717 }
 0x13c   :  { %v1304_v41 = vpop.permute.xlu1 %492 }
 0x13e   :  { %338 = vadd.xlane.f32.xlu0 %v337_v50  ;;  %v1322_v52 = vpop.permute.xlu0 %728 }
 0x140   :  { %v1308_v19 = vpop.permute.xlu1 %699 }
 0x142   :  { %350 = vadd.xlane.f32.xlu0 %v349_v57  ;;  %v1326_v50 = vpop.permute.xlu0 %739 }
 0x143   :  { %765 = vbcast.lane.b32.xlu1 %v759_v45, 264 }
 0x144   :  { %v1312_v44 = vpop.permute.xlu1 %710 }
 0x146   :  { %341 = vadd.xlane.f32.xlu0 %v340_v35  ;;  %v1330_v34 = vpop.permute.xlu0 %750 }
 0x147   :  { %776 = vbcast.lane.b32.xlu1 %v770_v2, 264 }
 0x148   :  { %v1316_v46 = vpop.permute.xlu1 %721 }
 0x14a   :  { %344 = vadd.xlane.f32.xlu0 %v343_v54 }
 0x14c   :  { %v1320_v51 = vpop.permute.xlu1 %732 }
 0x14e   :  { %353 = vadd.xlane.f32.xlu0 %v352_v17 }
 0x150   :  { %v1324_v56 = vpop.permute.xlu1 %743 }
 0x152   :  { %356 = vadd.xlane.f32.xlu0 %v355_v6 }
 0x154   :  { %v1328_v58 = vpop.permute.xlu1 %754 }
 0x156   :  { %359 = vadd.xlane.f32.xlu0 %v358_v13 }
 0x15a   :  { %362 = vadd.xlane.f32.xlu0 %v361_v60 }
 0x15e   :  { %365 = vadd.xlane.f32.xlu0 %v364_v39 }
 0x162   :  { %368 = vadd.xlane.f32.xlu0 %v367_v38 }
 0x178   :  { %761 = vbcast.lane.b32.xlu0 %v759_v45, 256 }
 0x17c   :  { %772 = vbcast.lane.b32.xlu0 %v770_v2, 256 }
 0x1bb   :  { %v327_v62 = vpop.xlane.xlu1 %326  ;;  %v324_v37 = vpop.xlane.xlu0 %323 }
 0x1bc   :  { %v375_v57 = vmul.f32 1.442695, %v327_v62  ;;  %v373_v45 = vmul.f32 1.442695, %v324_v37 }
 0x1be   :  { %989 = vpow2.f32 %v375_v57 }
 0x1bf   :  { %991 = vpow2.f32 %v373_v45  ;;  %v330_v53 = vpop.xlane.xlu0 %329  ;;  %v348_v2 = vpop.xlane.xlu1 %347 }
 0x1c0   :  { %v377_v0 = vmul.f32 1.442695, %v330_v53  ;;  %v389_v14 = vmul.f32 1.442695, %v348_v2 }
 0x1c2   :  { %993 = vpow2.f32 %v377_v0 }
 0x1c3   :  { %v333_v1 = vpop.xlane.xlu0 %332 }
 0x1c4   :  { %v379_v35 = vmul.f32 1.442695, %v333_v1 }
 0x1c6   :  { %995 = vpow2.f32 %v379_v35 }
 0x1c7   :  { %v336_v55 = vpop.xlane.xlu0 %335 }
 0x1c8   :  { %v990_v4 = vpop.eup %989  ;;  %v381_v54 = vmul.f32 1.442695, %v336_v55 }
 0x1c9   :  { %v992_v30 = vpop.eup %991  ;;  %v511_v12 = vmul.f32 %v990_v4, %v1193_v18 }
 0x1ca   :  { %997 = vpow2.f32 %v381_v54  ;;  %v510_v7 = vmul.f32 %v992_v30, %v1191_v16 }
 0x1cb   :  { %546 = vperm.xlu1 %988, %v511_v12   ;;  %v339_v17 = vpop.xlane.xlu0 %338  ;;  %999 = vpow2.f32 %v389_v14 }
 0x1cc   :  { %543 = vperm.xlu0 %987, %v510_v7   ;;  %v383_v63 = vmul.f32 1.442695, %v339_v17  ;;  %v994_v33 = vpop.eup %993  ;;  %v794_v38 = vmul.f32 %v1310_v43, %v510_v7 }
 0x1cd   :  { %v1335_v59 = vmul.f32 %v994_v33, %v1195_v9 }
 0x1ce   :  { %1001 = vpow2.f32 %v383_v63 }
 0x1cf   :  { %v351_v6 = vpop.xlane.xlu0 %350  ;;  %v796_v7 = vmul.f32 %v1314_v47, %v1335_v59 }
 0x1d0   :  { %v996_v49 = vpop.eup %995  ;;  %549 = vperm.xlu0 %987, %v1335_v59   ;;  %v391_v8 = vmul.f32 1.442695, %v351_v6 }
 0x1d1   :  { %v1339_v18 = vmul.f32 %v996_v49, %v1197_v20 }
 0x1d2   :  { %1003 = vpow2.f32 %v391_v8 }
 0x1d3   :  { %552 = vperm.xlu1 %988, %v1339_v18   ;;  %v342_v16 = vpop.xlane.xlu0 %341  ;;  %v797_v17 = vmul.f32 %v1312_v44, %v1339_v18 }
 0x1d4   :  { %v998_v10 = vpop.eup %997  ;;  %v385_v13 = vmul.f32 1.442695, %v342_v16 }
 0x1d5   :  { %v514_v27 = vmul.f32 %v998_v10, %v1199_v21  ;;  %v1000_v28 = vpop.eup %999 }
 0x1d6   :  { %1005 = vpow2.f32 %v385_v13  ;;  %v518_v31 = vmul.f32 %v1000_v28, %v1207_v24  ;;  %v795_v24 = vmul.f32 %v1308_v19, %v511_v12 }
 0x1d7   :  { %555 = vperm.xlu0 %987, %v514_v27   ;;  %v345_v9 = vpop.xlane.xlu0 %344 }
 0x1d8   :  { %v1002_v29 = vpop.eup %1001  ;;  %v387_v60 = vmul.f32 1.442695, %v345_v9 }
 0x1d9   :  { %v515_v36 = vmul.f32 %v1002_v29, %v1201_v11 }
 0x1da   :  { %1007 = vpow2.f32 %v387_v60 }
 0x1db   :  { %567 = vperm.xlu0 %987, %v518_v31   ;;  %558 = vperm.xlu1 %988, %v515_v36   ;;  %v354_v20 = vpop.xlane.xlu0 %353  ;;  %v799_v63 = vmul.f32 %v1316_v46, %v515_v36 }
 0x1dc   :  { %v1004_v39 = vpop.eup %1003  ;;  %v393_v15 = vmul.f32 1.442695, %v354_v20 }
 0x1dd   :  { %v519_v21 = vmul.f32 %v1004_v39, %v1209_v25 }
 0x1de   :  { %1009 = vpow2.f32 %v393_v15 }
 0x1df   :  { %827 = vperm.xlu0 %987, %v794_v38   ;;  %570 = vperm.xlu1 %988, %v519_v21   ;;  %v357_v62 = vpop.xlane.xlu0 %356  ;;  %v594_v38 = vadd.s32 4294967288, %v1116_v32 }
 0x1e0   :  { %v1006_v37 = vpop.eup %1005  ;;  %v395_v57 = vmul.f32 1.442695, %v357_v62 }
 0x1e1   :  { %v516_v11 = vmul.f32 %v1006_v37, %v1203_v22  ;;  %v1376_v37 = vsub.s32 %v594_v38, %v1055_v3 }
 0x1e2   :  { %1011 = vpow2.f32 %v395_v57  ;;  %v1380_v57 = vsub.s32 %v1116_v32, %v1055_v3 }
 0x1e3   :  { %830 = vperm.xlu1 %988, %v795_v24   ;;  %561 = vperm.xlu0 %987, %v516_v11   ;;  %v360_v45 = vpop.xlane.xlu0 %359 }
 0x1e4   :  { %v1008_v53 = vpop.eup %1007  ;;  %v397_v0 = vmul.f32 1.442695, %v360_v45 }
 0x1e5   :  { %v517_v43 = vmul.f32 %v1008_v53, %v1205_v23 }
 0x1e6   :  { %1013 = vpow2.f32 %v397_v0 }
 0x1e7   :  { %564 = vperm.xlu1 %988, %v517_v43   ;;  %v363_v25 = vpop.xlane.xlu0 %362  ;;  %v801_v46 = vmul.f32 %v1320_v51, %v517_v43 }
 0x1e8   :  { %v1010_v1 = vpop.eup %1009  ;;  %v399_v35 = vmul.f32 1.442695, %v363_v25 }
 0x1e9   :  { %v520_v2 = vmul.f32 %v1010_v1, %v1211_v26 }
 0x1ea   :  { %1015 = vpow2.f32 %v399_v35 }
 0x1eb   :  { %573 = vperm.xlu0 %987, %v520_v2   ;;  %v366_v19 = vpop.xlane.xlu0 %365 }
 0x1ec   :  { %v1012_v55 = vpop.eup %1011  ;;  %v401_v14 = vmul.f32 1.442695, %v366_v19 }
 0x1ed   :  { %v521_v22 = vmul.f32 %v1012_v55, %v1298_v5  ;;  %v798_v5 = vmul.f32 %v1318_v48, %v514_v27  ;;  %v800_v48 = vmul.f32 %v1322_v52, %v516_v11 }
 0x1ee   :  { %1017 = vpow2.f32 %v401_v14 }
 0x1ef   :  { %576 = vperm.xlu1 %988, %v521_v22   ;;  %v369_v54 = vpop.xlane.xlu0 %368 }
 0x1f0   :  { %v1014_v4 = vpop.eup %1013  ;;  %v403_v12 = vmul.f32 1.442695, %v369_v54 }
 0x1f1   :  { %v522_v30 = vmul.f32 %v1014_v4, %v1302_v61  ;;  %v802_v61 = vmul.f32 %v1326_v50, %v518_v31  ;;  %v804_v50 = vmul.f32 %v1330_v34, %v520_v2 }
 0x1f2   :  { %1019 = vpow2.f32 %v403_v12 }
 0x1f3   :  { %579 = vperm.xlu0 %987, %v522_v30   ;;  %v762_v6 = vpop.permute.xlu0 %761 }
 0x1f4   :  { %v1016_v23 = vpop.eup %1015  ;;  %v806_v49 = vmul.f32 %v762_v6, %v522_v30 }
 0x1f5   :  { %v523_v26 = vmul.f32 %v1016_v23, %v1300_v40  ;;  %v803_v40 = vmul.f32 %v1324_v56, %v519_v21  ;;  %v766_v56 = vpop.permute.xlu1 %765 }
 0x1f7   :  { %833 = vperm.xlu0 %987, %v796_v7   ;;  %582 = vperm.xlu1 %988, %v523_v26   ;;  %v773_v8 = vpop.permute.xlu0 %772  ;;  %v807_v52 = vmul.f32 %v766_v56, %v523_v26 }
 0x1f8   :  { %v1018_v33 = vpop.eup %1017 }
 0x1f9   :  { %v524_v47 = vmul.f32 %v1018_v33, %v1306_v42  ;;  %v805_v42 = vmul.f32 %v1328_v58, %v521_v22 }
 0x1fb   :  { %839 = vperm.xlu0 %987, %v798_v5   ;;  %836 = vperm.xlu1 %988, %v797_v17   ;;  %v808_v18 = vmul.f32 %v773_v8, %v524_v47 }
 0x1fc   :  { %v1020_v59 = vpop.eup %1019 }
 0x1fd   :  { %v525_v44 = vmul.f32 %v1020_v59, %v1304_v41  ;;  %v777_v41 = vpop.permute.xlu1 %776 }
 0x1ff   :  { %851 = vperm.xlu0 %987, %v802_v61   ;;  %842 = vperm.xlu1 %988, %v799_v63   ;;  %v809_v16 = vmul.f32 %v777_v41, %v525_v44 }
 0x203   :  { %854 = vperm.xlu1 %988, %v803_v40   ;;  %585 = vperm.xlu0 %987, %v524_v47  }
 0x207   :  { %845 = vperm.xlu0 %987, %v800_v48   ;;  %588 = vperm.xlu1 %988, %v525_v44  }
 0x20b   :  { %857 = vperm.xlu0 %987, %v804_v50   ;;  %848 = vperm.xlu1 %988, %v801_v46  }
 0x20f   :  { %860 = vperm.xlu1 %988, %v805_v42   ;;  %863 = vperm.xlu0 %987, %v806_v49  }
 0x213   :  { %866 = vperm.xlu1 %988, %v807_v52   ;;  %869 = vperm.xlu0 %987, %v808_v18  }
 0x217   :  { %872 = vperm.xlu1 %988, %v809_v16  }
 0x24a   :  { %v547_v10 = vpop.permute.xlu1 %546 }
 0x24b   :  { %v544_v34 = vpop.permute.xlu0 %543  ;;  %v598_v0 = vrot.slane %v547_v10, %v1376_v37 }
 0x24c   :  { %v593_v43 = vrot.slane %v544_v34, %v1380_v57 }
 0x24e   :  { %v600_v22 = vsel %vm599_vm2, %v598_v0, %v593_v43 }
 0x24f   :  { %v550_v51 = vpop.permute.xlu0 %549 }
 0x250   :  { %v604_v25 = vrot.slane %v550_v51, %v1380_v57 }
 0x252   :  { %v553_v13 = vpop.permute.xlu1 %552 }
 0x253   :  { %v608_v45 = vrot.slane %v553_v13, %v1376_v37 }
 0x255   :  { %v609_v2 = vsel %vm599_vm2, %v608_v45, %v604_v25 }
 0x256   :  { %v556_v27 = vpop.permute.xlu0 %555  ;;  %v665_v54 = vsel %vm664_vm5, %v609_v2, %v600_v22 }
 0x257   :  { %v613_v3 = vrot.slane %v556_v27, %v1380_v57 }
 0x25a   :  { %v559_v28 = vpop.permute.xlu1 %558  ;;  %v568_v9 = vpop.permute.xlu0 %567 }
 0x25b   :  { %v617_v53 = vrot.slane %v559_v28, %v1376_v37  ;;  %v631_v17 = vrot.slane %v568_v9, %v1380_v57 }
 0x25d   :  { %v618_v55 = vsel %vm599_vm2, %v617_v53, %v613_v3 }
 0x25e   :  { %v571_v29 = vpop.permute.xlu1 %570  ;;  %v1368_v58 = vpop.permute.xlu0 %827  ;;  %v667_v26 = vsel %vm666_vm6, %v618_v55, %v665_v54 }
 0x25f   :  { %v635_v30 = vrot.slane %v571_v29, %v1376_v37  ;;  %v877_v9 = vrot.slane %v1368_v58, %v1380_v57 }
 0x261   :  { %v636_v47 = vsel %vm599_vm2, %v635_v30, %v631_v17 }
 0x262   :  { %v1370_v60 = vpop.permute.xlu1 %830  ;;  %v562_v31 = vpop.permute.xlu0 %561 }
 0x263   :  { %v622_v19 = vrot.slane %v562_v31, %v1380_v57  ;;  %v881_v34 = vrot.slane %v1370_v60, %v1376_v37 }
 0x265   :  { %v882_v60 = vsel %vm599_vm2, %v881_v34, %v877_v9 }
 0x266   :  { %v565_v36 = vpop.permute.xlu1 %564 }
 0x267   :  { %v626_v1 = vrot.slane %v565_v36, %v1376_v37 }
 0x269   :  { %v627_v4 = vsel %vm599_vm2, %v626_v1, %v622_v19 }
 0x26a   :  { %v574_v20 = vpop.permute.xlu0 %573  ;;  %v669_v61 = vsel %vm668_vm7, %v627_v4, %v667_v26 }
 0x26b   :  { %v640_v5 = vrot.slane %v574_v20, %v1380_v57  ;;  %v671_v46 = vsel %vm670_vm8, %v636_v47, %v669_v61 }
 0x26e   :  { %v577_v39 = vpop.permute.xlu1 %576 }
 0x26f   :  { %v644_v14 = vrot.slane %v577_v39, %v1376_v37 }
 0x271   :  { %v645_v33 = vsel %vm599_vm2, %v644_v14, %v640_v5 }
 0x272   :  { %v580_v15 = vpop.permute.xlu0 %579  ;;  %v673_v6 = vsel %vm672_vm9, %v645_v33, %v671_v46 }
 0x273   :  { %v649_v63 = vrot.slane %v580_v15, %v1380_v57 }
 0x276   :  { %v583_v21 = vpop.permute.xlu1 %582  ;;  %v1373_v62 = vpop.permute.xlu0 %833 }
 0x277   :  { %v653_v23 = vrot.slane %v583_v21, %v1376_v37  ;;  %v886_v10 = vrot.slane %v1373_v62, %v1380_v57 }
 0x279   :  { %v654_v40 = vsel %vm599_vm2, %v653_v23, %v649_v63 }
 0x27a   :  { %v1382_v24 = vpop.permute.xlu1 %836  ;;  %v1384_v11 = vpop.permute.xlu0 %839  ;;  %v675_v42 = vsel %vm674_vm10, %v654_v40, %v673_v6 }
 0x27b   :  { %v890_v52 = vrot.slane %v1382_v24, %v1376_v37  ;;  %v895_v13 = vrot.slane %v1384_v11, %v1380_v57 }
 0x27d   :  { %v891_v29 = vsel %vm599_vm2, %v890_v52, %v886_v10 }
 0x27e   :  { %v843_v32 = vpop.permute.xlu1 %842  ;;  %v1393_v35 = vpop.permute.xlu0 %851  ;;  %v946_v15 = vsel %vm664_vm5, %v891_v29, %v882_v60 }
 0x27f   :  { %v899_v16 = vrot.slane %v843_v32, %v1376_v37  ;;  %v913_v11 = vrot.slane %v1393_v35, %v1380_v57 }
 0x281   :  { %v900_v36 = vsel %vm599_vm2, %v899_v16, %v895_v13 }
 0x282   :  { %v855_v12 = vpop.permute.xlu1 %854  ;;  %v586_v7 = vpop.permute.xlu0 %585  ;;  %v947_v62 = vsel %vm666_vm6, %v900_v36, %v946_v15 }
 0x283   :  { %v658_v44 = vrot.slane %v586_v7, %v1380_v57  ;;  %v917_v38 = vrot.slane %v855_v12, %v1376_v37 }
 0x285   :  { %v918_v25 = vsel %vm599_vm2, %v917_v38, %v913_v11 }
 0x286   :  { %v589_v59 = vpop.permute.xlu1 %588  ;;  %v846_v48 = vpop.permute.xlu0 %845 }
 0x287   :  { %v662_v50 = vrot.slane %v589_v59, %v1376_v37  ;;  %v904_v31 = vrot.slane %v846_v48, %v1380_v57 }
 0x289   :  { %v663_v49 = vsel %vm599_vm2, %v662_v50, %v658_v44 }
 0x28a   :  { %v849_v56 = vpop.permute.xlu1 %848  ;;  %v858_v8 = vpop.permute.xlu0 %857  ;;  %v677_v18 = vsel %vm676_vm11, %v663_v49, %v675_v42 }
 0x28b   :  { %v680_v41 = vsel %vm679_vm12, %v677_v18, 0.0  ;;  %v908_v51 = vrot.slane %v849_v56, %v1376_v37  ;;  %v922_v58 = vrot.slane %v858_v8, %v1380_v57 }
 0x28c   :  { %681 = vadd.xlane.f32.xlu0 %v680_v41 }
 0x28d   :  { %v909_v20 = vsel %vm599_vm2, %v908_v51, %v904_v31 }
 0x28e   :  { %v861_v27 = vpop.permute.xlu1 %860  ;;  %v864_v28 = vpop.permute.xlu0 %863  ;;  %v948_v45 = vsel %vm668_vm7, %v909_v20, %v947_v62 }
 0x28f   :  { %v926_v39 = vrot.slane %v861_v27, %v1376_v37  ;;  %v931_v53 = vrot.slane %v864_v28, %v1380_v57  ;;  %v949_v19 = vsel %vm670_vm8, %v918_v25, %v948_v45 }
 0x291   :  { %v927_v43 = vsel %vm599_vm2, %v926_v39, %v922_v58 }
 0x292   :  { %v867_v21 = vpop.permute.xlu1 %866  ;;  %v870_v0 = vpop.permute.xlu0 %869  ;;  %v950_v35 = vsel %vm672_vm9, %v927_v43, %v949_v19 }
 0x293   :  { %v935_v24 = vrot.slane %v867_v21, %v1376_v37  ;;  %v940_v32 = vrot.slane %v870_v0, %v1380_v57 }
 0x295   :  { %v936_v1 = vsel %vm599_vm2, %v935_v24, %v931_v53 }
 0x296   :  { %v873_v3 = vpop.permute.xlu1 %872  ;;  %v951_v22 = vsel %vm674_vm10, %v936_v1, %v950_v35 }
 0x297   :  { %v944_v2 = vrot.slane %v873_v3, %v1376_v37 }
 0x299   :  { %v945_v55 = vsel %vm599_vm2, %v944_v2, %v940_v32 }
 0x29a   :  { %v952_v4 = vsel %vm676_vm11, %v945_v55, %v951_v22 }
 0x29b   :  { %v954_v14 = vsel %vm679_vm12, %v952_v4, 0.0 }
 0x29c   :  { %955 = vadd.xlane.f32.xlu1 %v954_v14 }
 0x319   :  { %v682_v54 = vpop.xlane.xlu0 %681 }
 0x31a   :  { %1021 = vrcp.f32 %v682_v54 }
 0x324   :  { %v1022_v30 = vpop.eup %1021 }
 0x329   :  { %v956_v57 = vpop.xlane.xlu1 %955 }
 0x32a   :  { %v958_v23 = vmul.f32 %v1022_v30, %v956_v57 }
 0x32c   :  { %960 = vst.msk [vmem:[%s1465_s4] sm:$0xff] %vm959_vm13, %v958_v23 }

</bundles_post_ra>
